<compile_context>
chip_gen: v7x
topology: tpu7x:2x2x1
jax: 0.10.0
libtpu: 0.0.40
codegen_flags: <defaults>
</compile_context>

<pallas_src>
import functools

import jax
import jax.numpy as jnp
from jax import lax
from jax.experimental import pallas as pl
from jax.experimental.pallas import tpu as pltpu

EPS = 1e-5          # BatchNorm default eps
NEG_SLOPE = 0.1     # LeakyReLU slope


def _leaky(x):
    return jnp.maximum(x, NEG_SLOPE * x)


# ---------------------------------------------------------------------------
# Fused kernel.  Shapes (Dp = D rounded up to 8 sublanes, NHW = N*H*W lanes):
#   x_ref   : (Cin, Dp, NHW) VMEM  activations; rows >= D are zero padding
#   tab_ref : (28, Dp, NHW)  VMEM  rows 0..26: conv2 weight * zero-padding
#                                  validity mask per tap (kd*9 + kh*3 + kw);
#                                  row 27: (d < D) mask for BN2 statistics
#   g1/be1  : (Cin, 1, 1)    VMEM  BN1 affine (broadcast over sublanes/lanes)
#   w1_ref  : (Co*Cin,)      SMEM  1x1x1 conv weights (scalars)
#   b1_ref  : (Co,)          SMEM
#   g2/be2  : (1,)           SMEM  BN2 (BatchNorm3d(1)) affine
#   b2_ref  : (Co,)          SMEM
#   o_ref   : (Co, Dp, NHW)  VMEM  rows >= D are don't-care (wrapper slices)
# ---------------------------------------------------------------------------
def fused_attention_kernel(x_ref, tab_ref, g1_ref, be1_ref, w1_ref, b1_ref,
                           g2_ref, be2_ref, b2_ref, o_ref, *, D, W):
    Cin, Dp, NHW = x_ref.shape
    Co = o_ref.shape[0]            # == 1 (enforced by the wrapper)

    x = x_ref[...]                                       # (Cin, Dp, NHW) f32

    # ---- BatchNorm3d(Cin), training mode, one-pass stats, + LeakyReLU ------
    # Padded d-rows are zero, so plain sums are exact; divide by true count.
    cnt1 = float(D * NHW)
    s1 = jnp.sum(jnp.sum(x, axis=1, keepdims=True), axis=2, keepdims=True)
    q1 = jnp.sum(jnp.sum(x * x, axis=1, keepdims=True), axis=2, keepdims=True)
    mean1 = s1 * (1.0 / cnt1)                            # (Cin, 1, 1)
    var1 = jnp.maximum(q1 * (1.0 / cnt1) - mean1 * mean1, 0.0)
    scale1 = lax.rsqrt(var1 + EPS) * g1_ref[...]         # (Cin, 1, 1)
    shift1 = be1_ref[...] - mean1 * scale1
    xa = _leaky(x * scale1 + shift1)                     # (Cin, Dp, NHW)

    # ---- Conv3d(Cin, Co, 1): tiny K -> unrolled VPU FMAs (skip the MXU) ----
    # TODO(synk): once Cin*Co >= ~32, switch to jnp.dot on the MXU and replace
    # the static Python loops with lax.fori_loop to bound vreg live ranges.
    ys = []
    for co in range(Co):
        acc = jnp.zeros((Dp, NHW), jnp.float32)
        for ci in range(Cin):
            acc = acc + w1_ref[co * Cin + ci] * xa[ci]
        ys.append(acc + b1_ref[co])                      # (Dp, NHW)

    # ---- BatchNorm3d(1): stats over valid rows only, + LeakyReLU -----------
    dmask = tab_ref[27]                                  # (Dp, NHW), 1 where d < D
    cnt2 = float(Co * D * NHW)
    s2 = jnp.zeros((1, 1), jnp.float32)
    q2 = jnp.zeros((1, 1), jnp.float32)
    for y in ys:
        yv = y * dmask
        s2 = s2 + jnp.sum(jnp.sum(yv, axis=0, keepdims=True), axis=1, keepdims=True)
        q2 = q2 + jnp.sum(jnp.sum(yv * y, axis=0, keepdims=True), axis=1, keepdims=True)
    mean2 = s2 * (1.0 / cnt2)                            # (1, 1)
    var2 = jnp.maximum(q2 * (1.0 / cnt2) - mean2 * mean2, 0.0)
    scale2 = lax.rsqrt(var2 + EPS) * g2_ref[0]
    shift2 = be2_ref[0] - mean2 * scale2
    ya = [_leaky(y * scale2 + shift2) for y in ys]       # list of (Dp, NHW)

    # ---- Conv3d(Co, Co, 3, padding=1), Co == 1 ------------------------------
    # d-taps = sublane rolls, h/w-taps = lane rolls (XLU, overlaps VPU); per
    # tap the VALU work is one mul + one add against the folded weight*mask
    # table.  Wrapped rows/lanes are always zeroed by the folded mask, which
    # reproduces zero padding.
    # TODO(synk): cast the MAC operands to bf16 on v6e/v7x once a per-map tile
    # spans more than one f32 vreg; at (8,128) there is nothing to pack, and
    # v5e has no bf16 VPU.
    for co in range(Co):
        a = ya[co]                                       # Ci2 == Co == 1
        a_d = [pltpu.roll(a, 1, axis=0),                 # reads row d-1
               a,                                        # reads row d
               pltpu.roll(a, Dp - 1, axis=0)]            # reads row d+1
        acc = jnp.zeros((Dp, NHW), jnp.float32)
        for kd in range(3):
            ad = a_d[kd]
            for kh in range(3):
                for kw in range(3):
                    s = (kh - 1) * W + (kw - 1)          # lane offset
                    shifted = ad if s == 0 else pltpu.roll(ad, (-s) % NHW, axis=1)
                    acc = acc + tab_ref[kd * 9 + kh * 3 + kw] * shifted
        o_ref[co] = acc + b2_ref[co]


# ---------------------------------------------------------------------------
# Wrapper: layout plumbing only (tiny transposes / pads / the folded table).
# ---------------------------------------------------------------------------
def attention_forward(x, params):
    N, Cin, D, H, W = x.shape
    Co = params["w1"].shape[0]
    if Co != 1:
        raise ValueError("attention uses nn.BatchNorm3d(1); only out_ch == 1 is valid")
    HW = H * W
    NHW = N * HW
    Dp = -(-D // 8) * 8                                  # pad D to 8 sublanes

    # (N, Cin, D, H, W) -> (Cin, Dp, N*H*W); zero-padded so BN1 sums stay exact.
    xt = jnp.transpose(x, (1, 2, 0, 3, 4)).reshape(Cin, D, NHW)
    xp = jnp.pad(xt, ((0, 0), (0, Dp - D), (0, 0)))

    # Folded tap table: conv2 weight * zero-padding validity mask, per output
    # position, for each of the 27 taps; plus the (d < D) row mask (row 27).
    d_idx = lax.broadcasted_iota(jnp.int32, (Dp, NHW), 0)
    l_idx = lax.broadcasted_iota(jnp.int32, (Dp, NHW), 1)
    h_idx = (l_idx % HW) // W
    w_idx = l_idx % W
    w2 = params["w2"].reshape(27)                        # Co == Ci == 1
    rows = []
    for kd in range(3):
        vd = (d_idx + (kd - 1) >= 0) & (d_idx + (kd - 1) <= D - 1)
        for kh in range(3):
            vh = (h_idx + (kh - 1) >= 0) & (h_idx + (kh - 1) <= H - 1)
            for kw in range(3):
                vw = (w_idx + (kw - 1) >= 0) & (w_idx + (kw - 1) <= W - 1)
                m = (vd & vh & vw).astype(jnp.float32)
                rows.append(w2[kd * 9 + kh * 3 + kw] * m)
    rows.append((d_idx < D).astype(jnp.float32))
    tab = jnp.stack(rows)                                # (28, Dp, NHW)

    vmem = pl.BlockSpec(memory_space=pltpu.MemorySpace.VMEM)
    smem = pl.BlockSpec(memory_space=pltpu.MemorySpace.SMEM)
    kernel = functools.partial(fused_attention_kernel, D=D, W=W)

    out = pl.pallas_call(
        kernel,
        out_shape=jax.ShapeDtypeStruct((Co, Dp, NHW), jnp.float32),
        in_specs=[vmem, vmem, vmem, vmem, smem, smem, smem, smem, smem],
        out_specs=vmem,
    )(
        xp,
        tab,
        params["bn1_gamma"].reshape(Cin, 1, 1),
        params["bn1_beta"].reshape(Cin, 1, 1),
        params["w1"].reshape(-1),          # (Co*Cin,)  scalars in SMEM
        params["b1"],                      # (Co,)
        params["bn2_gamma"],               # (1,)
        params["bn2_beta"],                # (1,)
        params["b2"],                      # (Co,)
    )
    # (Co, Dp, NHW) -> (N, Co, D, H, W)
    out = out[:, :D, :].reshape(Co, D, N, H, W)
    return jnp.transpose(out, (2, 0, 1, 3, 4))


# ---------------------------------------------------------------------------
# Deterministic parameter init (shapes per the module __init__).
# ---------------------------------------------------------------------------
def init_params(key, in_ch, out_ch):
    k1, k2, k3, k4 = jax.random.split(key, 4)
    return dict(
        bn1_gamma=jnp.ones((in_ch,), jnp.float32),
        bn1_beta=jnp.zeros((in_ch,), jnp.float32),
        w1=jax.random.normal(k1, (out_ch, in_ch), jnp.float32) / jnp.sqrt(in_ch),
        b1=0.1 * jax.random.normal(k2, (out_ch,), jnp.float32),
        bn2_gamma=jnp.ones((1,), jnp.float32),
        bn2_beta=jnp.zeros((1,), jnp.float32),
        w2=jax.random.normal(k3, (out_ch, out_ch, 3, 3, 3), jnp.float32)
        / jnp.sqrt(27.0 * out_ch),
        b2=0.1 * jax.random.normal(k4, (out_ch,), jnp.float32),
    )


# Pure-JAX reference of the PyTorch forward (training-mode BatchNorm).
def ref_forward(x, p):
    g1 = p["bn1_gamma"].reshape(1, -1, 1, 1, 1)
    b1 = p["bn1_beta"].reshape(1, -1, 1, 1, 1)
    m1 = jnp.mean(x, axis=(0, 2, 3, 4), keepdims=True)
    v1 = jnp.mean(jnp.square(x - m1), axis=(0, 2, 3, 4), keepdims=True)
    xa = _leaky((x - m1) / jnp.sqrt(v1 + EPS) * g1 + b1)
    w1 = p["w1"][:, :, None, None, None]
    y = lax.conv_general_dilated(
        xa, w1, (1, 1, 1), "VALID",
        dimension_numbers=("NCDHW", "OIDHW", "NCDHW"),
    ) + p["b1"].reshape(1, -1, 1, 1, 1)
    m2 = jnp.mean(y, axis=(0, 2, 3, 4), keepdims=True)
    v2 = jnp.mean(jnp.square(y - m2), axis=(0, 2, 3, 4), keepdims=True)
    ya = _leaky((y - m2) / jnp.sqrt(v2 + EPS) * p["bn2_gamma"].reshape(1, 1, 1, 1, 1)
                + p["bn2_beta"].reshape(1, 1, 1, 1, 1))
    y2 = lax.conv_general_dilated(
        ya, p["w2"], (1, 1, 1), [(1, 1), (1, 1), (1, 1)],
        dimension_numbers=("NCDHW", "OIDHW", "NCDHW"),
    ) + p["b2"].reshape(1, -1, 1, 1, 1)
    return y2


if __name__ == "__main__":
    in_ch, out_ch = 4, 1      # out_ch must be 1 for nn.BatchNorm3d(1) to be valid
    N, D, H, W = 2, 6, 8, 8   # N*H*W = 128 lanes, D padded to 8 sublanes

    key = jax.random.PRNGKey(0)
    kx, kp = jax.random.split(key)
    x = jax.random.normal(kx, (N, in_ch, D, H, W), jnp.float32)
    params = init_params(kp, in_ch, out_ch)

    out = jax.jit(attention_forward)(x, params)
    out = jax.block_until_ready(out)

    ref = ref_forward(x, params)
    assert out.shape == (N, out_ch, D, H, W), out.shape
    if not bool(jnp.allclose(out, ref, atol=1e-3, rtol=1e-3)):
        raise AssertionError(
            f"mismatch vs reference, max abs err = {float(jnp.max(jnp.abs(out - ref)))}"
        )
    print("KERNEL_OK")
</pallas_src>

<mosaic_0001>
module attributes {stable_mosaic.version = 11 : i64} {
  func.func @fused_attention_kernel(%arg0: memref<4x8x128xf32, #tpu.memory_space<vmem>>, %arg1: memref<28x8x128xf32, #tpu.memory_space<vmem>>, %arg2: memref<4x1x1xf32, #tpu.memory_space<vmem>>, %arg3: memref<4x1x1xf32, #tpu.memory_space<vmem>>, %arg4: memref<4xf32, #tpu.memory_space<smem>>, %arg5: memref<1xf32, #tpu.memory_space<smem>>, %arg6: memref<1xf32, #tpu.memory_space<smem>>, %arg7: memref<1xf32, #tpu.memory_space<smem>>, %arg8: memref<1xf32, #tpu.memory_space<smem>>, %arg9: memref<1x8x128xf32, #tpu.memory_space<vmem>>) attributes {dimension_semantics = [], scalar_prefetch = 0 : i64, scratch_operands = 0 : i64, tpu.core_type = #tpu.core_type<tc>} {
    %c0 = arith.constant 0 : index
    %c0_0 = arith.constant 0 : index
    %c0_1 = arith.constant 0 : index
    %0 = vector.load %arg0[%c0, %c0_0, %c0_1] : memref<4x8x128xf32, #tpu.memory_space<vmem>>, vector<4x8x128xf32>
    %cst = arith.constant dense<0.000000e+00> : vector<4x128xf32>
    %1 = vector.multi_reduction <add>, %0, %cst [1] : vector<4x8x128xf32> to vector<4x128xf32>
    %2 = vector.shape_cast %1 : vector<4x128xf32> to vector<4x1x128xf32>
    %cst_2 = arith.constant dense<0.000000e+00> : vector<4x1xf32>
    %3 = vector.multi_reduction <add>, %2, %cst_2 [2] : vector<4x1x128xf32> to vector<4x1xf32>
    %4 = vector.shape_cast %3 : vector<4x1xf32> to vector<4x1x1xf32>
    %5 = arith.mulf %0, %0 : vector<4x8x128xf32>
    %cst_3 = arith.constant dense<0.000000e+00> : vector<4x128xf32>
    %6 = vector.multi_reduction <add>, %5, %cst_3 [1] : vector<4x8x128xf32> to vector<4x128xf32>
    %7 = vector.shape_cast %6 : vector<4x128xf32> to vector<4x1x128xf32>
    %cst_4 = arith.constant dense<0.000000e+00> : vector<4x1xf32>
    %8 = vector.multi_reduction <add>, %7, %cst_4 [2] : vector<4x1x128xf32> to vector<4x1xf32>
    %9 = vector.shape_cast %8 : vector<4x1xf32> to vector<4x1x1xf32>
    %cst_5 = arith.constant 0.00130208337 : f32
    %10 = vector.broadcast %cst_5 : f32 to vector<4x1x1xf32>
    %11 = arith.mulf %4, %10 : vector<4x1x1xf32>
    %cst_6 = arith.constant 0.00130208337 : f32
    %12 = vector.broadcast %cst_6 : f32 to vector<4x1x1xf32>
    %13 = arith.mulf %9, %12 : vector<4x1x1xf32>
    %14 = arith.mulf %11, %11 : vector<4x1x1xf32>
    %15 = arith.subf %13, %14 : vector<4x1x1xf32>
    %cst_7 = arith.constant 0.000000e+00 : f32
    %16 = vector.broadcast %cst_7 : f32 to vector<4x1x1xf32>
    %17 = arith.maximumf %15, %16 : vector<4x1x1xf32>
    %cst_8 = arith.constant 9.99999974E-6 : f32
    %18 = vector.broadcast %cst_8 : f32 to vector<4x1x1xf32>
    %19 = arith.addf %17, %18 : vector<4x1x1xf32>
    %20 = math.rsqrt %19 : vector<4x1x1xf32>
    %c0_9 = arith.constant 0 : index
    %c0_10 = arith.constant 0 : index
    %c0_11 = arith.constant 0 : index
    %21 = vector.load %arg2[%c0_9, %c0_10, %c0_11] : memref<4x1x1xf32, #tpu.memory_space<vmem>>, vector<4x1x1xf32>
    %22 = arith.mulf %20, %21 : vector<4x1x1xf32>
    %c0_12 = arith.constant 0 : index
    %c0_13 = arith.constant 0 : index
    %c0_14 = arith.constant 0 : index
    %23 = vector.load %arg3[%c0_12, %c0_13, %c0_14] : memref<4x1x1xf32, #tpu.memory_space<vmem>>, vector<4x1x1xf32>
    %24 = arith.mulf %11, %22 : vector<4x1x1xf32>
    %25 = arith.subf %23, %24 : vector<4x1x1xf32>
    %26 = vector.broadcast %22 : vector<4x1x1xf32> to vector<4x8x128xf32>
    %27 = arith.mulf %0, %26 : vector<4x8x128xf32>
    %28 = vector.broadcast %25 : vector<4x1x1xf32> to vector<4x8x128xf32>
    %29 = arith.addf %27, %28 : vector<4x8x128xf32>
    %cst_15 = arith.constant 1.000000e-01 : f32
    %30 = vector.broadcast %cst_15 : f32 to vector<4x8x128xf32>
    %31 = arith.mulf %30, %29 : vector<4x8x128xf32>
    %32 = arith.maximumf %29, %31 : vector<4x8x128xf32>
    %cst_16 = arith.constant 0.000000e+00 : f32
    %33 = vector.broadcast %cst_16 : f32 to vector<8x128xf32>
    %c0_17 = arith.constant 0 : index
    %34 = memref.load %arg4[%c0_17] : memref<4xf32, #tpu.memory_space<smem>>
    %35 = vector.extract_strided_slice %32 {offsets = [0, 0, 0], sizes = [1, 8, 128], strides = [1, 1, 1]} : vector<4x8x128xf32> to vector<1x8x128xf32>
    %36 = vector.shape_cast %35 : vector<1x8x128xf32> to vector<8x128xf32>
    %37 = vector.broadcast %34 : f32 to vector<8x128xf32>
    %38 = arith.mulf %37, %36 : vector<8x128xf32>
    %39 = arith.addf %33, %38 : vector<8x128xf32>
    %c1 = arith.constant 1 : index
    %40 = memref.load %arg4[%c1] : memref<4xf32, #tpu.memory_space<smem>>
    %41 = vector.extract_strided_slice %32 {offsets = [1, 0, 0], sizes = [1, 8, 128], strides = [1, 1, 1]} : vector<4x8x128xf32> to vector<1x8x128xf32>
    %42 = vector.shape_cast %41 : vector<1x8x128xf32> to vector<8x128xf32>
    %43 = vector.broadcast %40 : f32 to vector<8x128xf32>
    %44 = arith.mulf %43, %42 : vector<8x128xf32>
    %45 = arith.addf %39, %44 : vector<8x128xf32>
    %c2 = arith.constant 2 : index
    %46 = memref.load %arg4[%c2] : memref<4xf32, #tpu.memory_space<smem>>
    %47 = vector.extract_strided_slice %32 {offsets = [2, 0, 0], sizes = [1, 8, 128], strides = [1, 1, 1]} : vector<4x8x128xf32> to vector<1x8x128xf32>
    %48 = vector.shape_cast %47 : vector<1x8x128xf32> to vector<8x128xf32>
    %49 = vector.broadcast %46 : f32 to vector<8x128xf32>
    %50 = arith.mulf %49, %48 : vector<8x128xf32>
    %51 = arith.addf %45, %50 : vector<8x128xf32>
    %c3 = arith.constant 3 : index
    %52 = memref.load %arg4[%c3] : memref<4xf32, #tpu.memory_space<smem>>
    %53 = vector.extract_strided_slice %32 {offsets = [3, 0, 0], sizes = [1, 8, 128], strides = [1, 1, 1]} : vector<4x8x128xf32> to vector<1x8x128xf32>
    %54 = vector.shape_cast %53 : vector<1x8x128xf32> to vector<8x128xf32>
    %55 = vector.broadcast %52 : f32 to vector<8x128xf32>
    %56 = arith.mulf %55, %54 : vector<8x128xf32>
    %57 = arith.addf %51, %56 : vector<8x128xf32>
    %c0_18 = arith.constant 0 : index
    %58 = memref.load %arg5[%c0_18] : memref<1xf32, #tpu.memory_space<smem>>
    %59 = vector.broadcast %58 : f32 to vector<8x128xf32>
    %60 = arith.addf %57, %59 : vector<8x128xf32>
    %c27 = arith.constant 27 : index
    %c0_19 = arith.constant 0 : index
    %c0_20 = arith.constant 0 : index
    %61 = vector.load %arg1[%c27, %c0_19, %c0_20] : memref<28x8x128xf32, #tpu.memory_space<vmem>>, vector<1x8x128xf32>
    %62 = vector.shape_cast %61 : vector<1x8x128xf32> to vector<8x128xf32>
    %cst_21 = arith.constant 0.000000e+00 : f32
    %63 = vector.broadcast %cst_21 : f32 to vector<1x1xf32>
    %cst_22 = arith.constant 0.000000e+00 : f32
    %64 = vector.broadcast %cst_22 : f32 to vector<1x1xf32>
    %65 = arith.mulf %60, %62 : vector<8x128xf32>
    %cst_23 = arith.constant dense<0.000000e+00> : vector<128xf32>
    %66 = vector.multi_reduction <add>, %65, %cst_23 [0] : vector<8x128xf32> to vector<128xf32>
    %67 = vector.shape_cast %66 : vector<128xf32> to vector<1x128xf32>
    %cst_24 = arith.constant dense<0.000000e+00> : vector<1xf32>
    %68 = vector.multi_reduction <add>, %67, %cst_24 [1] : vector<1x128xf32> to vector<1xf32>
    %69 = vector.shape_cast %68 : vector<1xf32> to vector<1x1xf32>
    %70 = arith.addf %63, %69 : vector<1x1xf32>
    %71 = arith.mulf %65, %60 : vector<8x128xf32>
    %cst_25 = arith.constant dense<0.000000e+00> : vector<128xf32>
    %72 = vector.multi_reduction <add>, %71, %cst_25 [0] : vector<8x128xf32> to vector<128xf32>
    %73 = vector.shape_cast %72 : vector<128xf32> to vector<1x128xf32>
    %cst_26 = arith.constant dense<0.000000e+00> : vector<1xf32>
    %74 = vector.multi_reduction <add>, %73, %cst_26 [1] : vector<1x128xf32> to vector<1xf32>
    %75 = vector.shape_cast %74 : vector<1xf32> to vector<1x1xf32>
    %76 = arith.addf %64, %75 : vector<1x1xf32>
    %cst_27 = arith.constant 0.00130208337 : f32
    %77 = vector.broadcast %cst_27 : f32 to vector<1x1xf32>
    %78 = arith.mulf %70, %77 : vector<1x1xf32>
    %cst_28 = arith.constant 0.00130208337 : f32
    %79 = vector.broadcast %cst_28 : f32 to vector<1x1xf32>
    %80 = arith.mulf %76, %79 : vector<1x1xf32>
    %81 = arith.mulf %78, %78 : vector<1x1xf32>
    %82 = arith.subf %80, %81 : vector<1x1xf32>
    %cst_29 = arith.constant 0.000000e+00 : f32
    %83 = vector.broadcast %cst_29 : f32 to vector<1x1xf32>
    %84 = arith.maximumf %82, %83 : vector<1x1xf32>
    %cst_30 = arith.constant 9.99999974E-6 : f32
    %85 = vector.broadcast %cst_30 : f32 to vector<1x1xf32>
    %86 = arith.addf %84, %85 : vector<1x1xf32>
    %87 = math.rsqrt %86 : vector<1x1xf32>
    %c0_31 = arith.constant 0 : index
    %88 = memref.load %arg6[%c0_31] : memref<1xf32, #tpu.memory_space<smem>>
    %89 = vector.broadcast %88 : f32 to vector<1x1xf32>
    %90 = arith.mulf %87, %89 : vector<1x1xf32>
    %c0_32 = arith.constant 0 : index
    %91 = memref.load %arg7[%c0_32] : memref<1xf32, #tpu.memory_space<smem>>
    %92 = arith.mulf %78, %90 : vector<1x1xf32>
    %93 = vector.broadcast %91 : f32 to vector<1x1xf32>
    %94 = arith.subf %93, %92 : vector<1x1xf32>
    %95 = vector.broadcast %90 : vector<1x1xf32> to vector<8x128xf32>
    %96 = arith.mulf %60, %95 : vector<8x128xf32>
    %97 = vector.broadcast %94 : vector<1x1xf32> to vector<8x128xf32>
    %98 = arith.addf %96, %97 : vector<8x128xf32>
    %cst_33 = arith.constant 1.000000e-01 : f32
    %99 = vector.broadcast %cst_33 : f32 to vector<8x128xf32>
    %100 = arith.mulf %99, %98 : vector<8x128xf32>
    %101 = arith.maximumf %98, %100 : vector<8x128xf32>
    %c1_i32 = arith.constant 1 : i32
    %102 = tpu.dynamic_rotate %101 by %c1_i32 dim 0 : vector<8x128xf32>, i32 -> vector<8x128xf32>
    %c7_i32 = arith.constant 7 : i32
    %103 = tpu.dynamic_rotate %101 by %c7_i32 dim 0 : vector<8x128xf32>, i32 -> vector<8x128xf32>
    %cst_34 = arith.constant 0.000000e+00 : f32
    %104 = vector.broadcast %cst_34 : f32 to vector<8x128xf32>
    %c9_i32 = arith.constant 9 : i32
    %105 = tpu.dynamic_rotate %102 by %c9_i32 dim 1 : vector<8x128xf32>, i32 -> vector<8x128xf32>
    %c0_35 = arith.constant 0 : index
    %c0_36 = arith.constant 0 : index
    %c0_37 = arith.constant 0 : index
    %106 = vector.load %arg1[%c0_35, %c0_36, %c0_37] : memref<28x8x128xf32, #tpu.memory_space<vmem>>, vector<1x8x128xf32>
    %107 = vector.shape_cast %106 : vector<1x8x128xf32> to vector<8x128xf32>
    %108 = arith.mulf %107, %105 : vector<8x128xf32>
    %109 = arith.addf %104, %108 : vector<8x128xf32>
    %c8_i32 = arith.constant 8 : i32
    %110 = tpu.dynamic_rotate %102 by %c8_i32 dim 1 : vector<8x128xf32>, i32 -> vector<8x128xf32>
    %c1_38 = arith.constant 1 : index
    %c0_39 = arith.constant 0 : index
    %c0_40 = arith.constant 0 : index
    %111 = vector.load %arg1[%c1_38, %c0_39, %c0_40] : memref<28x8x128xf32, #tpu.memory_space<vmem>>, vector<1x8x128xf32>
    %112 = vector.shape_cast %111 : vector<1x8x128xf32> to vector<8x128xf32>
    %113 = arith.mulf %112, %110 : vector<8x128xf32>
    %114 = arith.addf %109, %113 : vector<8x128xf32>
    %c7_i32_41 = arith.constant 7 : i32
    %115 = tpu.dynamic_rotate %102 by %c7_i32_41 dim 1 : vector<8x128xf32>, i32 -> vector<8x128xf32>
    %c2_42 = arith.constant 2 : index
    %c0_43 = arith.constant 0 : index
    %c0_44 = arith.constant 0 : index
    %116 = vector.load %arg1[%c2_42, %c0_43, %c0_44] : memref<28x8x128xf32, #tpu.memory_space<vmem>>, vector<1x8x128xf32>
    %117 = vector.shape_cast %116 : vector<1x8x128xf32> to vector<8x128xf32>
    %118 = arith.mulf %117, %115 : vector<8x128xf32>
    %119 = arith.addf %114, %118 : vector<8x128xf32>
    %c1_i32_45 = arith.constant 1 : i32
    %120 = tpu.dynamic_rotate %102 by %c1_i32_45 dim 1 : vector<8x128xf32>, i32 -> vector<8x128xf32>
    %c3_46 = arith.constant 3 : index
    %c0_47 = arith.constant 0 : index
    %c0_48 = arith.constant 0 : index
    %121 = vector.load %arg1[%c3_46, %c0_47, %c0_48] : memref<28x8x128xf32, #tpu.memory_space<vmem>>, vector<1x8x128xf32>
    %122 = vector.shape_cast %121 : vector<1x8x128xf32> to vector<8x128xf32>
    %123 = arith.mulf %122, %120 : vector<8x128xf32>
    %124 = arith.addf %119, %123 : vector<8x128xf32>
    %c4 = arith.constant 4 : index
    %c0_49 = arith.constant 0 : index
    %c0_50 = arith.constant 0 : index
    %125 = vector.load %arg1[%c4, %c0_49, %c0_50] : memref<28x8x128xf32, #tpu.memory_space<vmem>>, vector<1x8x128xf32>
    %126 = vector.shape_cast %125 : vector<1x8x128xf32> to vector<8x128xf32>
    %127 = arith.mulf %126, %102 : vector<8x128xf32>
    %128 = arith.addf %124, %127 : vector<8x128xf32>
    %c127_i32 = arith.constant 127 : i32
    %129 = tpu.dynamic_rotate %102 by %c127_i32 dim 1 : vector<8x128xf32>, i32 -> vector<8x128xf32>
    %c5 = arith.constant 5 : index
    %c0_51 = arith.constant 0 : index
    %c0_52 = arith.constant 0 : index
    %130 = vector.load %arg1[%c5, %c0_51, %c0_52] : memref<28x8x128xf32, #tpu.memory_space<vmem>>, vector<1x8x128xf32>
    %131 = vector.shape_cast %130 : vector<1x8x128xf32> to vector<8x128xf32>
    %132 = arith.mulf %131, %129 : vector<8x128xf32>
    %133 = arith.addf %128, %132 : vector<8x128xf32>
    %c121_i32 = arith.constant 121 : i32
    %134 = tpu.dynamic_rotate %102 by %c121_i32 dim 1 : vector<8x128xf32>, i32 -> vector<8x128xf32>
    %c6 = arith.constant 6 : index
    %c0_53 = arith.constant 0 : index
    %c0_54 = arith.constant 0 : index
    %135 = vector.load %arg1[%c6, %c0_53, %c0_54] : memref<28x8x128xf32, #tpu.memory_space<vmem>>, vector<1x8x128xf32>
    %136 = vector.shape_cast %135 : vector<1x8x128xf32> to vector<8x128xf32>
    %137 = arith.mulf %136, %134 : vector<8x128xf32>
    %138 = arith.addf %133, %137 : vector<8x128xf32>
    %c120_i32 = arith.constant 120 : i32
    %139 = tpu.dynamic_rotate %102 by %c120_i32 dim 1 : vector<8x128xf32>, i32 -> vector<8x128xf32>
    %c7 = arith.constant 7 : index
    %c0_55 = arith.constant 0 : index
    %c0_56 = arith.constant 0 : index
    %140 = vector.load %arg1[%c7, %c0_55, %c0_56] : memref<28x8x128xf32, #tpu.memory_space<vmem>>, vector<1x8x128xf32>
    %141 = vector.shape_cast %140 : vector<1x8x128xf32> to vector<8x128xf32>
    %142 = arith.mulf %141, %139 : vector<8x128xf32>
    %143 = arith.addf %138, %142 : vector<8x128xf32>
    %c119_i32 = arith.constant 119 : i32
    %144 = tpu.dynamic_rotate %102 by %c119_i32 dim 1 : vector<8x128xf32>, i32 -> vector<8x128xf32>
    %c8 = arith.constant 8 : index
    %c0_57 = arith.constant 0 : index
    %c0_58 = arith.constant 0 : index
    %145 = vector.load %arg1[%c8, %c0_57, %c0_58] : memref<28x8x128xf32, #tpu.memory_space<vmem>>, vector<1x8x128xf32>
    %146 = vector.shape_cast %145 : vector<1x8x128xf32> to vector<8x128xf32>
    %147 = arith.mulf %146, %144 : vector<8x128xf32>
    %148 = arith.addf %143, %147 : vector<8x128xf32>
    %c9_i32_59 = arith.constant 9 : i32
    %149 = tpu.dynamic_rotate %101 by %c9_i32_59 dim 1 : vector<8x128xf32>, i32 -> vector<8x128xf32>
    %c9 = arith.constant 9 : index
    %c0_60 = arith.constant 0 : index
    %c0_61 = arith.constant 0 : index
    %150 = vector.load %arg1[%c9, %c0_60, %c0_61] : memref<28x8x128xf32, #tpu.memory_space<vmem>>, vector<1x8x128xf32>
    %151 = vector.shape_cast %150 : vector<1x8x128xf32> to vector<8x128xf32>
    %152 = arith.mulf %151, %149 : vector<8x128xf32>
    %153 = arith.addf %148, %152 : vector<8x128xf32>
    %c8_i32_62 = arith.constant 8 : i32
    %154 = tpu.dynamic_rotate %101 by %c8_i32_62 dim 1 : vector<8x128xf32>, i32 -> vector<8x128xf32>
    %c10 = arith.constant 10 : index
    %c0_63 = arith.constant 0 : index
    %c0_64 = arith.constant 0 : index
    %155 = vector.load %arg1[%c10, %c0_63, %c0_64] : memref<28x8x128xf32, #tpu.memory_space<vmem>>, vector<1x8x128xf32>
    %156 = vector.shape_cast %155 : vector<1x8x128xf32> to vector<8x128xf32>
    %157 = arith.mulf %156, %154 : vector<8x128xf32>
    %158 = arith.addf %153, %157 : vector<8x128xf32>
    %c7_i32_65 = arith.constant 7 : i32
    %159 = tpu.dynamic_rotate %101 by %c7_i32_65 dim 1 : vector<8x128xf32>, i32 -> vector<8x128xf32>
    %c11 = arith.constant 11 : index
    %c0_66 = arith.constant 0 : index
    %c0_67 = arith.constant 0 : index
    %160 = vector.load %arg1[%c11, %c0_66, %c0_67] : memref<28x8x128xf32, #tpu.memory_space<vmem>>, vector<1x8x128xf32>
    %161 = vector.shape_cast %160 : vector<1x8x128xf32> to vector<8x128xf32>
    %162 = arith.mulf %161, %159 : vector<8x128xf32>
    %163 = arith.addf %158, %162 : vector<8x128xf32>
    %c1_i32_68 = arith.constant 1 : i32
    %164 = tpu.dynamic_rotate %101 by %c1_i32_68 dim 1 : vector<8x128xf32>, i32 -> vector<8x128xf32>
    %c12 = arith.constant 12 : index
    %c0_69 = arith.constant 0 : index
    %c0_70 = arith.constant 0 : index
    %165 = vector.load %arg1[%c12, %c0_69, %c0_70] : memref<28x8x128xf32, #tpu.memory_space<vmem>>, vector<1x8x128xf32>
    %166 = vector.shape_cast %165 : vector<1x8x128xf32> to vector<8x128xf32>
    %167 = arith.mulf %166, %164 : vector<8x128xf32>
    %168 = arith.addf %163, %167 : vector<8x128xf32>
    %c13 = arith.constant 13 : index
    %c0_71 = arith.constant 0 : index
    %c0_72 = arith.constant 0 : index
    %169 = vector.load %arg1[%c13, %c0_71, %c0_72] : memref<28x8x128xf32, #tpu.memory_space<vmem>>, vector<1x8x128xf32>
    %170 = vector.shape_cast %169 : vector<1x8x128xf32> to vector<8x128xf32>
    %171 = arith.mulf %170, %101 : vector<8x128xf32>
    %172 = arith.addf %168, %171 : vector<8x128xf32>
    %c127_i32_73 = arith.constant 127 : i32
    %173 = tpu.dynamic_rotate %101 by %c127_i32_73 dim 1 : vector<8x128xf32>, i32 -> vector<8x128xf32>
    %c14 = arith.constant 14 : index
    %c0_74 = arith.constant 0 : index
    %c0_75 = arith.constant 0 : index
    %174 = vector.load %arg1[%c14, %c0_74, %c0_75] : memref<28x8x128xf32, #tpu.memory_space<vmem>>, vector<1x8x128xf32>
    %175 = vector.shape_cast %174 : vector<1x8x128xf32> to vector<8x128xf32>
    %176 = arith.mulf %175, %173 : vector<8x128xf32>
    %177 = arith.addf %172, %176 : vector<8x128xf32>
    %c121_i32_76 = arith.constant 121 : i32
    %178 = tpu.dynamic_rotate %101 by %c121_i32_76 dim 1 : vector<8x128xf32>, i32 -> vector<8x128xf32>
    %c15 = arith.constant 15 : index
    %c0_77 = arith.constant 0 : index
    %c0_78 = arith.constant 0 : index
    %179 = vector.load %arg1[%c15, %c0_77, %c0_78] : memref<28x8x128xf32, #tpu.memory_space<vmem>>, vector<1x8x128xf32>
    %180 = vector.shape_cast %179 : vector<1x8x128xf32> to vector<8x128xf32>
    %181 = arith.mulf %180, %178 : vector<8x128xf32>
    %182 = arith.addf %177, %181 : vector<8x128xf32>
    %c120_i32_79 = arith.constant 120 : i32
    %183 = tpu.dynamic_rotate %101 by %c120_i32_79 dim 1 : vector<8x128xf32>, i32 -> vector<8x128xf32>
    %c16 = arith.constant 16 : index
    %c0_80 = arith.constant 0 : index
    %c0_81 = arith.constant 0 : index
    %184 = vector.load %arg1[%c16, %c0_80, %c0_81] : memref<28x8x128xf32, #tpu.memory_space<vmem>>, vector<1x8x128xf32>
    %185 = vector.shape_cast %184 : vector<1x8x128xf32> to vector<8x128xf32>
    %186 = arith.mulf %185, %183 : vector<8x128xf32>
    %187 = arith.addf %182, %186 : vector<8x128xf32>
    %c119_i32_82 = arith.constant 119 : i32
    %188 = tpu.dynamic_rotate %101 by %c119_i32_82 dim 1 : vector<8x128xf32>, i32 -> vector<8x128xf32>
    %c17 = arith.constant 17 : index
    %c0_83 = arith.constant 0 : index
    %c0_84 = arith.constant 0 : index
    %189 = vector.load %arg1[%c17, %c0_83, %c0_84] : memref<28x8x128xf32, #tpu.memory_space<vmem>>, vector<1x8x128xf32>
    %190 = vector.shape_cast %189 : vector<1x8x128xf32> to vector<8x128xf32>
    %191 = arith.mulf %190, %188 : vector<8x128xf32>
    %192 = arith.addf %187, %191 : vector<8x128xf32>
    %c9_i32_85 = arith.constant 9 : i32
    %193 = tpu.dynamic_rotate %103 by %c9_i32_85 dim 1 : vector<8x128xf32>, i32 -> vector<8x128xf32>
    %c18 = arith.constant 18 : index
    %c0_86 = arith.constant 0 : index
    %c0_87 = arith.constant 0 : index
    %194 = vector.load %arg1[%c18, %c0_86, %c0_87] : memref<28x8x128xf32, #tpu.memory_space<vmem>>, vector<1x8x128xf32>
    %195 = vector.shape_cast %194 : vector<1x8x128xf32> to vector<8x128xf32>
    %196 = arith.mulf %195, %193 : vector<8x128xf32>
    %197 = arith.addf %192, %196 : vector<8x128xf32>
    %c8_i32_88 = arith.constant 8 : i32
    %198 = tpu.dynamic_rotate %103 by %c8_i32_88 dim 1 : vector<8x128xf32>, i32 -> vector<8x128xf32>
    %c19 = arith.constant 19 : index
    %c0_89 = arith.constant 0 : index
    %c0_90 = arith.constant 0 : index
    %199 = vector.load %arg1[%c19, %c0_89, %c0_90] : memref<28x8x128xf32, #tpu.memory_space<vmem>>, vector<1x8x128xf32>
    %200 = vector.shape_cast %199 : vector<1x8x128xf32> to vector<8x128xf32>
    %201 = arith.mulf %200, %198 : vector<8x128xf32>
    %202 = arith.addf %197, %201 : vector<8x128xf32>
    %c7_i32_91 = arith.constant 7 : i32
    %203 = tpu.dynamic_rotate %103 by %c7_i32_91 dim 1 : vector<8x128xf32>, i32 -> vector<8x128xf32>
    %c20 = arith.constant 20 : index
    %c0_92 = arith.constant 0 : index
    %c0_93 = arith.constant 0 : index
    %204 = vector.load %arg1[%c20, %c0_92, %c0_93] : memref<28x8x128xf32, #tpu.memory_space<vmem>>, vector<1x8x128xf32>
    %205 = vector.shape_cast %204 : vector<1x8x128xf32> to vector<8x128xf32>
    %206 = arith.mulf %205, %203 : vector<8x128xf32>
    %207 = arith.addf %202, %206 : vector<8x128xf32>
    %c1_i32_94 = arith.constant 1 : i32
    %208 = tpu.dynamic_rotate %103 by %c1_i32_94 dim 1 : vector<8x128xf32>, i32 -> vector<8x128xf32>
    %c21 = arith.constant 21 : index
    %c0_95 = arith.constant 0 : index
    %c0_96 = arith.constant 0 : index
    %209 = vector.load %arg1[%c21, %c0_95, %c0_96] : memref<28x8x128xf32, #tpu.memory_space<vmem>>, vector<1x8x128xf32>
    %210 = vector.shape_cast %209 : vector<1x8x128xf32> to vector<8x128xf32>
    %211 = arith.mulf %210, %208 : vector<8x128xf32>
    %212 = arith.addf %207, %211 : vector<8x128xf32>
    %c22 = arith.constant 22 : index
    %c0_97 = arith.constant 0 : index
    %c0_98 = arith.constant 0 : index
    %213 = vector.load %arg1[%c22, %c0_97, %c0_98] : memref<28x8x128xf32, #tpu.memory_space<vmem>>, vector<1x8x128xf32>
    %214 = vector.shape_cast %213 : vector<1x8x128xf32> to vector<8x128xf32>
    %215 = arith.mulf %214, %103 : vector<8x128xf32>
    %216 = arith.addf %212, %215 : vector<8x128xf32>
    %c127_i32_99 = arith.constant 127 : i32
    %217 = tpu.dynamic_rotate %103 by %c127_i32_99 dim 1 : vector<8x128xf32>, i32 -> vector<8x128xf32>
    %c23 = arith.constant 23 : index
    %c0_100 = arith.constant 0 : index
    %c0_101 = arith.constant 0 : index
    %218 = vector.load %arg1[%c23, %c0_100, %c0_101] : memref<28x8x128xf32, #tpu.memory_space<vmem>>, vector<1x8x128xf32>
    %219 = vector.shape_cast %218 : vector<1x8x128xf32> to vector<8x128xf32>
    %220 = arith.mulf %219, %217 : vector<8x128xf32>
    %221 = arith.addf %216, %220 : vector<8x128xf32>
    %c121_i32_102 = arith.constant 121 : i32
    %222 = tpu.dynamic_rotate %103 by %c121_i32_102 dim 1 : vector<8x128xf32>, i32 -> vector<8x128xf32>
    %c24 = arith.constant 24 : index
    %c0_103 = arith.constant 0 : index
    %c0_104 = arith.constant 0 : index
    %223 = vector.load %arg1[%c24, %c0_103, %c0_104] : memref<28x8x128xf32, #tpu.memory_space<vmem>>, vector<1x8x128xf32>
    %224 = vector.shape_cast %223 : vector<1x8x128xf32> to vector<8x128xf32>
    %225 = arith.mulf %224, %222 : vector<8x128xf32>
    %226 = arith.addf %221, %225 : vector<8x128xf32>
    %c120_i32_105 = arith.constant 120 : i32
    %227 = tpu.dynamic_rotate %103 by %c120_i32_105 dim 1 : vector<8x128xf32>, i32 -> vector<8x128xf32>
    %c25 = arith.constant 25 : index
    %c0_106 = arith.constant 0 : index
    %c0_107 = arith.constant 0 : index
    %228 = vector.load %arg1[%c25, %c0_106, %c0_107] : memref<28x8x128xf32, #tpu.memory_space<vmem>>, vector<1x8x128xf32>
    %229 = vector.shape_cast %228 : vector<1x8x128xf32> to vector<8x128xf32>
    %230 = arith.mulf %229, %227 : vector<8x128xf32>
    %231 = arith.addf %226, %230 : vector<8x128xf32>
    %c119_i32_108 = arith.constant 119 : i32
    %232 = tpu.dynamic_rotate %103 by %c119_i32_108 dim 1 : vector<8x128xf32>, i32 -> vector<8x128xf32>
    %c26 = arith.constant 26 : index
    %c0_109 = arith.constant 0 : index
    %c0_110 = arith.constant 0 : index
    %233 = vector.load %arg1[%c26, %c0_109, %c0_110] : memref<28x8x128xf32, #tpu.memory_space<vmem>>, vector<1x8x128xf32>
    %234 = vector.shape_cast %233 : vector<1x8x128xf32> to vector<8x128xf32>
    %235 = arith.mulf %234, %232 : vector<8x128xf32>
    %236 = arith.addf %231, %235 : vector<8x128xf32>
    %c0_111 = arith.constant 0 : index
    %237 = memref.load %arg8[%c0_111] : memref<1xf32, #tpu.memory_space<smem>>
    %238 = vector.broadcast %237 : f32 to vector<8x128xf32>
    %239 = arith.addf %236, %238 : vector<8x128xf32>
    %c0_112 = arith.constant 0 : index
    %c0_113 = arith.constant 0 : index
    %c0_114 = arith.constant 0 : index
    %240 = vector.load %arg9[%c0_112, %c0_113, %c0_114] : memref<1x8x128xf32, #tpu.memory_space<vmem>>, vector<1x8x128xf32>
    %241 = vector.shape_cast %240 : vector<1x8x128xf32> to vector<8x128xf32>
    %242 = vector.shape_cast %239 : vector<8x128xf32> to vector<1x8x128xf32>
    tpu.vector_store %arg9[%c0_112, %c0_113, %c0_114], %242 {strides = array<i32>} : memref<1x8x128xf32, #tpu.memory_space<vmem>>, vector<1x8x128xf32>,
    return
  }
}

</mosaic_0001>

<bundles_post_ra>
// kernel: attention_forward.1
= control target key start
LH: loop header
LB: loop body
LE: loop exit
PB: predicated region body
PF: predicated region fallthrough
CT: control target
= control target key end

     0   :  { %18 = vsyncpa [#allocation7], 0  ;;  %s803_s0 = inlined_call_operand.vmem [shape: f32[4,8,128], index: 0, kind: input, shape index: {}]   ;;  %s804_s1 = inlined_call_operand.vmem [shape: f32[28,8,128], index: 1, kind: input, shape index: {}]   ;;  %s805_s2 = inlined_call_operand.vmem [shape: f32[4,1,1], index: 2, kind: input, shape index: {}]   ;;  %s806_s3 = inlined_call_operand.vmem [shape: f32[4,1,1], index: 3, kind: input, shape index: {}]   ;;  %s807_s4 = inlined_call_operand.vmem [shape: f32[4], index: 4, kind: input, shape index: {}]   ;;  %s808_s5 = inlined_call_operand.<no memory space> [shape: f32[1], index: 5, kind: input, shape index: {}]   ;;  %s809_s6 = inlined_call_operand.<no memory space> [shape: f32[1], index: 6, kind: input, shape index: {}]   ;;  %s810_s7 = inlined_call_operand.<no memory space> [shape: f32[1], index: 7, kind: input, shape index: {}]   ;;  %s811_s8 = inlined_call_operand.<no memory space> [shape: f32[1], index: 8, kind: input, shape index: {}]   ;;  %s812_s9 = inlined_call_operand.vmem [shape: f32[1,8,128], index: 9, kind: output, shape index: {}]  }
   0x1   :  { %s33_s11 = sshll.u32 %s807_s4, 4  ;;  %s34_s11 = int_to_ptr.vmem [resolvable:$true] %s33_s11 }
   0x2   :  { %s534_s12 = scalar_lea.vmem %s34_s11, 16  ;;  %p539_p1 = scmp.lt.s32.totalorder %s34_s11, %s34_s11 }
   0x3   :  { %p535_p0 = scmp.ne.s32.totalorder %s34_s11, %s534_s12  ;;  %p540_p2 = scmp.lt.s32.totalorder %s534_s12, %s534_s12 }
   0x5   :  { %p541_p3 = por %p540_p2, %p539_p1 }
   0x7   :  { %p542_p4 = pnand %p541_p3, %p535_p0 }
   0x9   :  { %545 = shalt.err (!%p542_p4)
}
   0xa   :  { %s548_s13 = smov [#allocation6]  }
   0xb   :  { %36 = dma.vmem_to_smem %s34_s11, 16, %s548_s13, [#allocation7]  }
   0xc   :  { %546 = dma.done.wait [#allocation7], 16  }
   0xd   :  { %547 = vsyncadd [#allocation7], 4294967280 }
   0xe   :  { %48 = sfence }
   0xf   :  { %v614_v0 = vld [vmem:[%s803_s0 + $0x10] sm:$0xff]  ;;  %v619_v1 = vld [vmem:[%s803_s0] sm:$0xff]  ;;  %v624_v2 = vld [vmem:[%s803_s0 + $0x18] sm:$0xff]  ;;  %v549_v56 = vmov 0   ;;  %s482_s14 = sld [smem:[#allocation6 + $0x1]]  ;;  %s257_s15 = sld [smem:[#allocation6]] }
  0x10   :  { %v65_v3 = vrot.slane %v614_v0, 4  ;;  %v53_v4 = vrot.slane %v619_v1, 4  ;;  %v71_v5 = vrot.slane %v624_v2, 4  ;;  %v632_v6 = vld [vmem:[%s803_s0 + $0x8] sm:$0xff]  ;;  %v85_v7 = vmul.f32 %v619_v1, %v619_v1  ;;  %523 = vset.pattern.permute.xlu1 %v549_v56  ;;  %522 = vset.pattern.permute.xlu0 %v549_v56  ;;  %v159_v56 = vld [vmem:[%s806_s3 + $0x2] sm:$0x1] }
  0x11   :  { %v59_v8 = vrot.slane %v632_v6, 4  ;;  %v86_v9 = vmul.f32 %v632_v6, %v632_v6  ;;  %v88_v10 = vmul.f32 %v624_v2, %v624_v2  ;;  %v87_v11 = vmul.f32 %v614_v0, %v614_v0  ;;  %s484_s16 = sld [smem:[#allocation6 + $0x3]]  ;;  %s550_s22 = smov 8  }
  0x12   :  { %v66_v12 = vadd.f32 %v65_v3, %v614_v0  ;;  %v54_v13 = vadd.f32 %v53_v4, %v619_v1  ;;  %v72_v14 = vadd.f32 %v71_v5, %v624_v2  ;;  %v89_v15 = vrot.slane %v85_v7, 4  ;;  %s551_s23 = smov 9   ;;  %s553_s24 = smov 1  }
  0x13   :  { %v60_v16 = vadd.f32 %v59_v8, %v632_v6  ;;  %v95_v17 = vrot.slane %v86_v9, 4  ;;  %v107_v18 = vrot.slane %v88_v10, 4  ;;  %v101_v19 = vrot.slane %v87_v11, 4  ;;  %s554_s25 = smov 127   ;;  %s556_s26 = smov 120  }
  0x14   :  { %v67_v20 = vrot.slane %v66_v12, 2  ;;  %v55_v21 = vrot.slane %v54_v13, 2  ;;  %v73_v22 = vrot.slane %v72_v14, 2  ;;  %v90_v23 = vadd.f32 %v89_v15, %v85_v7  ;;  %s557_s27 = smov 119  }
  0x15   :  { %v61_v24 = vrot.slane %v60_v16, 2  ;;  %v96_v25 = vadd.f32 %v95_v17, %v86_v9  ;;  %v108_v26 = vadd.f32 %v107_v18, %v88_v10  ;;  %v102_v27 = vadd.f32 %v101_v19, %v87_v11 }
  0x16   :  { %v68_v28 = vadd.f32 %v67_v20, %v66_v12  ;;  %v56_v29 = vadd.f32 %v55_v21, %v54_v13  ;;  %v74_v30 = vadd.f32 %v73_v22, %v72_v14  ;;  %v91_v31 = vrot.slane %v90_v23, 2 }
  0x17   :  { %v62_v32 = vadd.f32 %v61_v24, %v60_v16  ;;  %v97_v33 = vrot.slane %v96_v25, 2  ;;  %v109_v34 = vrot.slane %v108_v26, 2  ;;  %v103_v35 = vrot.slane %v102_v27, 2 }
  0x18   :  { %v69_v36 = vrot.slane %v68_v28, 1  ;;  %v57_v37 = vrot.slane %v56_v29, 1  ;;  %v75_v38 = vrot.slane %v74_v30, 1  ;;  %v92_v39 = vadd.f32 %v91_v31, %v90_v23  ;;  %v149_v31 = vld [vmem:[%s805_s2] sm:$0x1] }
  0x19   :  { %v63_v40 = vrot.slane %v62_v32, 1  ;;  %v98_v41 = vadd.f32 %v97_v33, %v96_v25  ;;  %v110_v44 = vadd.f32 %v109_v34, %v108_v26  ;;  %v104_v45 = vadd.f32 %v103_v35, %v102_v27  ;;  %v150_v33 = vld [vmem:[%s805_s2 + $0x1] sm:$0x1] }
  0x1a   :  { %v70_v42 = vadd.f32 %v69_v36, %v68_v28  ;;  %v58_v43 = vadd.f32 %v57_v37, %v56_v29  ;;  %v76_v46 = vadd.f32 %v75_v38, %v74_v30  ;;  %v93_v48 = vrot.slane %v92_v39, 1 }
  0x1b   :  { %v64_v47 = vadd.f32 %v63_v40, %v62_v32  ;;  %v99_v49 = vrot.slane %v98_v41, 1  ;;  %v111_v52 = vrot.slane %v110_v44, 1  ;;  %v105_v53 = vrot.slane %v104_v45, 1 }
  0x1c   :  { %81 = vadd.xlane.f32.xlu1 %v70_v42  ;;  %77 = vadd.xlane.f32.xlu0 %v58_v43  ;;  %v94_v50 = vadd.f32 %v93_v48, %v92_v39  ;;  %v173_v27 = vlaneseq  ;;  %v151_v39 = vld [vmem:[%s805_s2 + $0x2] sm:$0x1]  ;;  %v152_v43 = vld [vmem:[%s805_s2 + $0x3] sm:$0x1]  ;;  %v157_v48 = vld [vmem:[%s806_s3] sm:$0x1] }
  0x1d   :  { %v100_v51 = vadd.f32 %v99_v49, %v98_v41  ;;  %v112_v54 = vadd.f32 %v111_v52, %v110_v44  ;;  %v106_v55 = vadd.f32 %v105_v53, %v104_v45  ;;  %v158_v52 = vld [vmem:[%s806_s3 + $0x1] sm:$0x1] }
  0x1e   :  { %v174_v30 = vshrl.u32 %v173_v27, 7 }
  0x20   :  { %83 = vadd.xlane.f32.xlu1 %v76_v46  ;;  %79 = vadd.xlane.f32.xlu0 %v64_v47  ;;  %v175_v32 = vsub.s32 0, %v174_v30  ;;  %v270_v30 = vstv %s484_s16 }
  0x24   :  { %113 = vadd.xlane.f32.xlu1 %v94_v50  ;;  %115 = vadd.xlane.f32.xlu0 %v100_v51 }
  0x28   :  { %119 = vadd.xlane.f32.xlu1 %v112_v54  ;;  %117 = vadd.xlane.f32.xlu0 %v106_v55 }
  0xa9   :  { %v82_v57 = vpop.xlane.xlu1 %81  ;;  %v78_v58 = vpop.xlane.xlu0 %77 }
  0xaa   :  { %v121_v61 = vmul.f32 0.0013020834, %v78_v58  ;;  %v123_v63 = vmul.f32 0.0013020834, %v82_v57 }
  0xac   :  { %v129_v7 = vmul.f32 %v121_v61, %v121_v61  ;;  %v131_v13 = vmul.f32 %v123_v63, %v123_v63 }
  0xad   :  { %v84_v59 = vpop.xlane.xlu1 %83  ;;  %v80_v60 = vpop.xlane.xlu0 %79 }
  0xae   :  { %v122_v62 = vmul.f32 0.0013020834, %v80_v60  ;;  %v647_v3 = vmul.f32 0.0013020834, %v84_v59  ;;  %v160_v60 = vld [vmem:[%s806_s3 + $0x3] sm:$0x1] }
  0xaf   :  { %s483_s3 = sld [smem:[#allocation6 + $0x2]] }
  0xb0   :  { %v130_v8 = vmul.f32 %v122_v62, %v122_v62  ;;  %v132_v14 = vmul.f32 %v647_v3, %v647_v3 }
  0xb1   :  { %v114_v4 = vpop.xlane.xlu1 %113  ;;  %v116_v5 = vpop.xlane.xlu0 %115 }
  0xb2   :  { %v125_v9 = vmul.f32 0.0013020834, %v114_v4  ;;  %v126_v10 = vmul.f32 0.0013020834, %v116_v5 }
  0xb4   :  { %v133_v11 = vsub.f32 %v125_v9, %v129_v7  ;;  %v134_v12 = vsub.f32 %v126_v10, %v130_v8 }
  0xb5   :  { %v120_v15 = vpop.xlane.xlu1 %119  ;;  %v118_v16 = vpop.xlane.xlu0 %117 }
  0xb6   :  { %v137_v17 = vmax.f32 %v133_v11, 0.0  ;;  %v138_v18 = vmax.f32 %v134_v12, 0.0  ;;  %v128_v19 = vmul.f32 0.0013020834, %v120_v15  ;;  %v127_v20 = vmul.f32 0.0013020834, %v118_v16 }
  0xb8   :  { %v141_v21 = vadd.f32 1e-05, %v137_v17  ;;  %v142_v22 = vadd.f32 1e-05, %v138_v18  ;;  %v136_v23 = vsub.f32 %v128_v19, %v132_v14  ;;  %v135_v24 = vsub.f32 %v127_v20, %v131_v13 }
  0xb9   :  { %v262_v20 = vstv %s482_s14 }
  0xba   :  { %524 = vrsqrt.f32 %v141_v21  ;;  %v140_v25 = vmax.f32 %v136_v23, 0.0  ;;  %v139_v26 = vmax.f32 %v135_v24, 0.0  ;;  %v258_v23 = vstv %s257_s15 }
  0xbb   :  { %526 = vrsqrt.f32 %v142_v22 }
  0xbc   :  { %v144_v28 = vadd.f32 1e-05, %v140_v25  ;;  %v143_v29 = vadd.f32 1e-05, %v139_v26 }
  0xbe   :  { %528 = vrsqrt.f32 %v144_v28 }
  0xbf   :  { %530 = vrsqrt.f32 %v143_v29 }
  0xc4   :  { %v525_v34 = vpop.eup %524 }
  0xc5   :  { %v527_v35 = vpop.eup %526  ;;  %v153_v36 = vmul.f32 %v525_v34, %v149_v31 }
  0xc6   :  { %v154_v37 = vmul.f32 %v527_v35, %v150_v33 }
  0xc7   :  { %v176_v38 = vrot.slane %v153_v36, %v175_v32  ;;  %v161_v47 = vmul.f32 %v153_v36, %v121_v61  ;;  %v485_v36 = vld [vmem:[%s804_s1 + $0xd8] sm:$0xff] }
  0xc8   :  { %v529_v40 = vpop.eup %528  ;;  %v180_v41 = vrot.slane %v154_v37, %v175_v32  ;;  %v162_v51 = vmul.f32 %v154_v37, %v122_v62 }
  0xc9   :  { %v531_v42 = vpop.eup %530  ;;  %190 = vperm.xlu0 %522, %v176_v38   ;;  %v156_v46 = vmul.f32 %v529_v40, %v152_v43  ;;  %v165_v50 = vsub.f32 %v157_v48, %v161_v47 }
  0xca   :  { %194 = vperm.xlu1 %523, %v180_v41   ;;  %v155_v44 = vmul.f32 %v531_v42, %v151_v39  ;;  %v166_v54 = vsub.f32 %v158_v52, %v162_v51 }
  0xcb   :  { %v188_v49 = vrot.slane %v156_v46, %v175_v32  ;;  %v216_v53 = vrot.slane %v165_v50, %v175_v32  ;;  %v164_v59 = vmul.f32 %v156_v46, %v647_v3 }
  0xcc   :  { %v184_v45 = vrot.slane %v155_v44, %v175_v32  ;;  %v163_v55 = vmul.f32 %v155_v44, %v123_v63  ;;  %v220_v57 = vrot.slane %v166_v54, %v175_v32 }
  0xcd   :  { %v168_v62 = vsub.f32 %v160_v60, %v164_v59  ;;  %v306_v60 = vstv %s809_s6  ;;  %s552_s6 = smov 7  }
  0xce   :  { %198 = vperm.xlu1 %523, %v184_v45   ;;  %v167_v58 = vsub.f32 %v159_v56, %v163_v55 }
  0xcf   :  { %v228_v4 = vrot.slane %v168_v62, %v175_v32 }
  0xd0   :  { %v224_v61 = vrot.slane %v167_v58, %v175_v32 }
  0xd2   :  { %202 = vperm.xlu1 %523, %v188_v49  }
  0xd6   :  { %230 = vperm.xlu1 %523, %v216_v53  }
  0xda   :  { %234 = vperm.xlu1 %523, %v220_v57  }
  0xde   :  { %238 = vperm.xlu1 %523, %v224_v61  }
  0xe2   :  { %242 = vperm.xlu1 %523, %v228_v4   ;;  %v310_v4 = vstv %s810_s7  ;;  %s555_s7 = smov 121  }
 0x148   :  { %v191_v8 = vpop.permute.xlu0 %190 }
 0x149   :  { %v195_v63 = vpop.permute.xlu1 %194  ;;  %v205_v10 = vmul.f32 %v191_v8, %v619_v1 }
 0x14a   :  { %v206_v3 = vmul.f32 %v195_v63, %v632_v6  ;;  %v266_v6 = vstv %s483_s3 }
 0x14d   :  { %v199_v5 = vpop.permute.xlu1 %198 }
 0x14e   :  { %v207_v14 = vmul.f32 %v199_v5, %v614_v0 }
 0x151   :  { %v203_v7 = vpop.permute.xlu1 %202 }
 0x152   :  { %v208_v21 = vmul.f32 %v203_v7, %v624_v2  ;;  %v274_v2 = vstv %s808_s5 }
 0x155   :  { %v231_v9 = vpop.permute.xlu1 %230 }
 0x156   :  { %v245_v11 = vadd.f32 %v231_v9, %v205_v10 }
 0x158   :  { %v249_v15 = vmul.f32 0.1, %v245_v11 }
 0x159   :  { %v235_v12 = vpop.permute.xlu1 %234 }
 0x15a   :  { %v246_v13 = vadd.f32 %v235_v12, %v206_v3  ;;  %v253_v1 = vmax.f32 %v245_v11, %v249_v15  ;;  %v486_v12 = vld [vmem:[%s804_s1 + $0x8] sm:$0xff] }
 0x15c   :  { %v250_v16 = vmul.f32 0.1, %v246_v13  ;;  %v259_v28 = vmul.f32 %v258_v23, %v253_v1  ;;  %v489_v23 = vld [vmem:[%s804_s1 + $0x20] sm:$0xff] }
 0x15d   :  { %v239_v17 = vpop.permute.xlu1 %238 }
 0x15e   :  { %v254_v18 = vmax.f32 %v246_v13, %v250_v16  ;;  %v247_v19 = vadd.f32 %v239_v17, %v207_v14  ;;  %v320_v13 = vld [vmem:[%s804_s1] sm:$0xff] }
 0x160   :  { %v251_v22 = vmul.f32 0.1, %v247_v19  ;;  %v263_v25 = vmul.f32 %v262_v20, %v254_v18  ;;  %v487_v18 = vld [vmem:[%s804_s1 + $0x10] sm:$0xff]  ;;  %v488_v20 = vld [vmem:[%s804_s1 + $0x18] sm:$0xff] }
 0x161   :  { %v243_v24 = vpop.permute.xlu1 %242 }
 0x162   :  { %v255_v26 = vmax.f32 %v247_v19, %v251_v22  ;;  %v248_v27 = vadd.f32 %v243_v24, %v208_v21  ;;  %v264_v31 = vadd.f32 %v263_v25, %v259_v28  ;;  %v490_v25 = vld [vmem:[%s804_s1 + $0x28] sm:$0xff] }
 0x164   :  { %v267_v29 = vmul.f32 %v266_v6, %v255_v26  ;;  %v252_v0 = vmul.f32 0.1, %v248_v27 }
 0x166   :  { %v256_v32 = vmax.f32 %v248_v27, %v252_v0  ;;  %v268_v33 = vadd.f32 %v267_v29, %v264_v31  ;;  %v491_v0 = vld [vmem:[%s804_s1 + $0x30] sm:$0xff] }
 0x168   :  { %v271_v34 = vmul.f32 %v270_v30, %v256_v32  ;;  %v492_v32 = vld [vmem:[%s804_s1 + $0x38] sm:$0xff] }
 0x16a   :  { %v272_v35 = vadd.f32 %v271_v34, %v268_v33 }
 0x16c   :  { %v275_v37 = vadd.f32 %v274_v2, %v272_v35 }
 0x16e   :  { %v278_v38 = vmul.f32 %v485_v36, %v275_v37  ;;  %v493_v36 = vld [vmem:[%s804_s1 + $0x40] sm:$0xff] }
 0x170   :  { %v279_v39 = vrot.slane %v278_v38, 4  ;;  %v288_v40 = vmul.f32 %v278_v38, %v275_v37 }
 0x172   :  { %v280_v41 = vadd.f32 %v279_v39, %v278_v38  ;;  %v289_v42 = vrot.slane %v288_v40, 4  ;;  %v494_v39 = vld [vmem:[%s804_s1 + $0x48] sm:$0xff] }
 0x174   :  { %v281_v43 = vrot.slane %v280_v41, 2  ;;  %v290_v44 = vadd.f32 %v289_v42, %v288_v40 }
 0x176   :  { %v282_v45 = vadd.f32 %v281_v43, %v280_v41  ;;  %v291_v46 = vrot.slane %v290_v44, 2 }
 0x178   :  { %v283_v47 = vrot.slane %v282_v45, 1  ;;  %v292_v48 = vadd.f32 %v291_v46, %v290_v44  ;;  %v495_v44 = vld [vmem:[%s804_s1 + $0x50] sm:$0xff] }
 0x17a   :  { %v284_v49 = vadd.f32 %v283_v47, %v282_v45  ;;  %v293_v50 = vrot.slane %v292_v48, 1  ;;  %v496_v47 = vld [vmem:[%s804_s1 + $0x58] sm:$0xff] }
 0x17c   :  { %285 = vadd.xlane.f32.xlu1 %v284_v49  ;;  %v294_v51 = vadd.f32 %v293_v50, %v292_v48 }
 0x17e   :  { %295 = vadd.xlane.f32.xlu0 %v294_v51 }
 0x209   :  { %v286_v52 = vpop.xlane.xlu1 %285 }
 0x20a   :  { %v298_v53 = vmul.f32 0.0013020834, %v286_v52  ;;  %v497_v52 = vld [vmem:[%s804_s1 + $0x60] sm:$0xff] }
 0x20b   :  { %v296_v54 = vpop.xlane.xlu0 %295 }
 0x20c   :  { %v300_v55 = vmul.f32 %v298_v53, %v298_v53  ;;  %v299_v56 = vmul.f32 0.0013020834, %v296_v54 }
 0x20e   :  { %v301_v57 = vsub.f32 %v299_v56, %v300_v55  ;;  %v498_v55 = vld [vmem:[%s804_s1 + $0x68] sm:$0xff] }
 0x210   :  { %v302_v58 = vmax.f32 %v301_v57, 0.0 }
 0x212   :  { %v303_v59 = vadd.f32 1e-05, %v302_v58 }
 0x214   :  { %532 = vrsqrt.f32 %v303_v59 }
 0x21e   :  { %v533_v61 = vpop.eup %532 }
 0x21f   :  { %v307_v62 = vmul.f32 %v533_v61, %v306_v60  ;;  %v499_v60 = vld [vmem:[%s804_s1 + $0x70] sm:$0xff] }
 0x221   :  { %v309_v63 = vmul.f32 %v307_v62, %v298_v53  ;;  %v312_v7 = vmul.f32 %v307_v62, %v275_v37 }
 0x223   :  { %v311_v5 = vsub.f32 %v310_v4, %v309_v63  ;;  %v500_v4 = vld [vmem:[%s804_s1 + $0x78] sm:$0xff] }
 0x225   :  { %v313_v8 = vadd.f32 %v312_v7, %v311_v5 }
 0x227   :  { %v314_v9 = vmul.f32 0.1, %v313_v8 }
 0x229   :  { %v692_v10 = vmax.f32 %v313_v8, %v314_v9  ;;  %v501_v9 = vld [vmem:[%s804_s1 + $0x80] sm:$0xff] }
 0x22b   :  { %v316_v3 = vrot.slane %v692_v10, 7  ;;  %v704_v11 = vrot.slane %v692_v10, 1  ;;  %v395_v62 = vmul.f32 %v498_v55, %v692_v10 }
 0x22d   :  { %323 = vrot.lane.b32.xlu1 %v316_v3, %s550_s22  ;;  %318 = vrot.lane.b32.xlu0 %v316_v3, %s551_s23  ;;  %v343_v29 = vmul.f32 %v489_v23, %v316_v3  ;;  %v505_v23 = vld [vmem:[%s804_s1 + $0xa0] sm:$0xff] }
 0x231   :  { %329 = vrot.lane.b32.xlu1 %v316_v3, %s552_s6  ;;  %335 = vrot.lane.b32.xlu0 %v316_v3, %s553_s24 }
 0x235   :  { %345 = vrot.lane.b32.xlu1 %v316_v3, %s554_s25  ;;  %351 = vrot.lane.b32.xlu0 %v316_v3, %s555_s7 }
 0x239   :  { %357 = vrot.lane.b32.xlu1 %v316_v3, %s556_s26  ;;  %363 = vrot.lane.b32.xlu0 %v316_v3, %s557_s27 }
 0x23d   :  { %369 = vrot.lane.b32.xlu1 %v692_v10, %s551_s23  ;;  %375 = vrot.lane.b32.xlu0 %v692_v10, %s550_s22 }
 0x241   :  { %381 = vrot.lane.b32.xlu1 %v692_v10, %s552_s6  ;;  %387 = vrot.lane.b32.xlu0 %v692_v10, %s553_s24 }
 0x245   :  { %397 = vrot.lane.b32.xlu1 %v692_v10, %s554_s25  ;;  %403 = vrot.lane.b32.xlu0 %v692_v10, %s555_s7 }
 0x249   :  { %409 = vrot.lane.b32.xlu1 %v692_v10, %s556_s26  ;;  %415 = vrot.lane.b32.xlu0 %v692_v10, %s557_s27 }
 0x24d   :  { %421 = vrot.lane.b32.xlu1 %v704_v11, %s551_s23  ;;  %427 = vrot.lane.b32.xlu0 %v704_v11, %s550_s22 }
 0x251   :  { %433 = vrot.lane.b32.xlu1 %v704_v11, %s552_s6  ;;  %439 = vrot.lane.b32.xlu0 %v704_v11, %s553_s24 }
 0x255   :  { %449 = vrot.lane.b32.xlu1 %v704_v11, %s554_s25  ;;  %455 = vrot.lane.b32.xlu0 %v704_v11, %s555_s7 }
 0x259   :  { %461 = vrot.lane.b32.xlu1 %v704_v11, %s556_s26  ;;  %467 = vrot.lane.b32.xlu0 %v704_v11, %s557_s27 }
 0x29f   :  { %v324_v14 = vpop.permute.xlu1 %323  ;;  %v319_v15 = vpop.permute.xlu0 %318 }
 0x2a0   :  { %v327_v16 = vmul.f32 %v486_v12, %v324_v14  ;;  %v321_v17 = vmul.f32 %v320_v13, %v319_v15  ;;  %v502_v13 = vld [vmem:[%s804_s1 + $0x88] sm:$0xff] }
 0x2a2   :  { %v328_v1 = vadd.f32 %v327_v16, %v321_v17  ;;  %v503_v17 = vld [vmem:[%s804_s1 + $0x90] sm:$0xff] }
 0x2a3   :  { %v330_v19 = vpop.permute.xlu1 %329  ;;  %v336_v21 = vpop.permute.xlu0 %335 }
 0x2a4   :  { %v333_v22 = vmul.f32 %v487_v18, %v330_v19  ;;  %v339_v24 = vmul.f32 %v488_v20, %v336_v21  ;;  %v504_v20 = vld [vmem:[%s804_s1 + $0x98] sm:$0xff] }
 0x2a6   :  { %v334_v6 = vadd.f32 %v333_v22, %v328_v1 }
 0x2a7   :  { %v346_v26 = vpop.permute.xlu1 %345  ;;  %v352_v27 = vpop.permute.xlu0 %351 }
 0x2a8   :  { %v340_v28 = vadd.f32 %v339_v24, %v334_v6  ;;  %v349_v31 = vmul.f32 %v490_v25, %v346_v26  ;;  %v355_v35 = vmul.f32 %v491_v0, %v352_v27  ;;  %v506_v26 = vld [vmem:[%s804_s1 + $0xa8] sm:$0xff] }
 0x2aa   :  { %v344_v30 = vadd.f32 %v343_v29, %v340_v28  ;;  %v507_v29 = vld [vmem:[%s804_s1 + $0xb0] sm:$0xff] }
 0x2ab   :  { %v358_v33 = vpop.permute.xlu1 %357  ;;  %v364_v34 = vpop.permute.xlu0 %363 }
 0x2ac   :  { %v350_v2 = vadd.f32 %v349_v31, %v344_v30  ;;  %v361_v38 = vmul.f32 %v492_v32, %v358_v33  ;;  %v367_v43 = vmul.f32 %v493_v36, %v364_v34  ;;  %v508_v32 = vld [vmem:[%s804_s1 + $0xb8] sm:$0xff] }
 0x2ae   :  { %v356_v37 = vadd.f32 %v355_v35, %v350_v2  ;;  %v447_v2 = vmul.f32 %v507_v29, %v704_v11  ;;  %v509_v35 = vld [vmem:[%s804_s1 + $0xc0] sm:$0xff] }
 0x2af   :  { %v370_v40 = vpop.permute.xlu1 %369  ;;  %v376_v41 = vpop.permute.xlu0 %375 }
 0x2b0   :  { %v362_v42 = vadd.f32 %v361_v38, %v356_v37  ;;  %v373_v46 = vmul.f32 %v494_v39, %v370_v40  ;;  %v379_v51 = vmul.f32 %v495_v44, %v376_v41  ;;  %v510_v38 = vld [vmem:[%s804_s1 + $0xc8] sm:$0xff] }
 0x2b2   :  { %v368_v45 = vadd.f32 %v367_v43, %v362_v42  ;;  %v511_v42 = vld [vmem:[%s804_s1 + $0xd0] sm:$0xff] }
 0x2b3   :  { %v382_v48 = vpop.permute.xlu1 %381  ;;  %v388_v49 = vpop.permute.xlu0 %387 }
 0x2b4   :  { %v374_v50 = vadd.f32 %v373_v46, %v368_v45  ;;  %v385_v54 = vmul.f32 %v496_v47, %v382_v48  ;;  %v391_v59 = vmul.f32 %v497_v52, %v388_v49  ;;  %v474_v47 = vstv %s811_s8 }
 0x2b6   :  { %v380_v53 = vadd.f32 %v379_v51, %v374_v50 }
 0x2b7   :  { %v398_v56 = vpop.permute.xlu1 %397  ;;  %v404_v57 = vpop.permute.xlu0 %403 }
 0x2b8   :  { %v386_v58 = vadd.f32 %v385_v54, %v380_v53  ;;  %v401_v8 = vmul.f32 %v499_v60, %v398_v56  ;;  %v407_v12 = vmul.f32 %v500_v4, %v404_v57 }
 0x2ba   :  { %v392_v61 = vadd.f32 %v391_v59, %v386_v58 }
 0x2bb   :  { %v410_v63 = vpop.permute.xlu1 %409  ;;  %v416_v5 = vpop.permute.xlu0 %415 }
 0x2bc   :  { %v396_v7 = vadd.f32 %v395_v62, %v392_v61  ;;  %v413_v16 = vmul.f32 %v501_v9, %v410_v63  ;;  %v419_v19 = vmul.f32 %v502_v13, %v416_v5 }
 0x2be   :  { %v402_v3 = vadd.f32 %v401_v8, %v396_v7 }
 0x2bf   :  { %v422_v14 = vpop.permute.xlu1 %421  ;;  %v428_v10 = vpop.permute.xlu0 %427 }
 0x2c0   :  { %v408_v15 = vadd.f32 %v407_v12, %v402_v3  ;;  %v425_v22 = vmul.f32 %v503_v17, %v422_v14  ;;  %v431_v25 = vmul.f32 %v504_v20, %v428_v10 }
 0x2c2   :  { %v414_v18 = vadd.f32 %v413_v16, %v408_v15 }
 0x2c3   :  { %v434_v21 = vpop.permute.xlu1 %433  ;;  %v440_v6 = vpop.permute.xlu0 %439 }
 0x2c4   :  { %v420_v1 = vadd.f32 %v419_v19, %v414_v18  ;;  %v437_v28 = vmul.f32 %v505_v23, %v434_v21  ;;  %v443_v31 = vmul.f32 %v506_v26, %v440_v6 }
 0x2c6   :  { %v426_v24 = vadd.f32 %v425_v22, %v420_v1 }
 0x2c7   :  { %v450_v0 = vpop.permute.xlu1 %449  ;;  %v456_v33 = vpop.permute.xlu0 %455 }
 0x2c8   :  { %v432_v27 = vadd.f32 %v431_v25, %v426_v24  ;;  %v453_v37 = vmul.f32 %v508_v32, %v450_v0  ;;  %v459_v41 = vmul.f32 %v509_v35, %v456_v33 }
 0x2ca   :  { %v438_v30 = vadd.f32 %v437_v28, %v432_v27 }
 0x2cb   :  { %v462_v39 = vpop.permute.xlu1 %461  ;;  %v468_v43 = vpop.permute.xlu0 %467 }
 0x2cc   :  { %v444_v34 = vadd.f32 %v443_v31, %v438_v30  ;;  %v465_v11 = vmul.f32 %v510_v38, %v462_v39  ;;  %v471_v46 = vmul.f32 %v511_v42, %v468_v43 }
 0x2ce   :  { %v448_v36 = vadd.f32 %v447_v2, %v444_v34 }
 0x2d0   :  { %v454_v40 = vadd.f32 %v453_v37, %v448_v36 }
 0x2d2   :  { %v460_v44 = vadd.f32 %v459_v41, %v454_v40 }
 0x2d4   :  { %v466_v45 = vadd.f32 %v465_v11, %v460_v44 }
 0x2d6   :  { %v472_v48 = vadd.f32 %v471_v46, %v466_v45 }
 0x2d8   :  { %v475_v49 = vadd.f32 %v474_v47, %v472_v48 }
 0x2da   :  { %476 = vst [vmem:[%s812_s9] sm:$0xff] %v475_v49 }
 0x2db   :  { %481 = vsyncpa [#allocation7], 1 }

</bundles_post_ra>
